<compile_context>
chip_gen: v7x
topology: tpu7x:2x2x1
jax: 0.10.0
libtpu: 0.0.40
codegen_flags: <defaults>
</compile_context>

<pallas_src>
import math
import jax
import jax.numpy as jnp
from jax.experimental import pallas as pl
from jax.experimental.pallas import tpu as pltpu


def _gelu_tanh(x):
    # GELU with tanh approximation (matches torch.nn.GELU(approximate='tanh'))
    c = math.sqrt(2.0 / math.pi)
    return 0.5 * x * (1.0 + jnp.tanh(c * (x + 0.044715 * x * x * x)))


def _round_up(x, m):
    return ((x + m - 1) // m) * m


def _vmem_capacity_bytes():
    # v5e/v6e: 128 MiB per TensorCore, v7x: 64 MiB.  Fall back to the
    # conservative 64 MiB if the query is unavailable.
    try:
        info = pltpu.get_tpu_info()
        for attr in ("vmem_capacity_bytes", "vmem_size_bytes"):
            cap = getattr(info, attr, None)
            if cap:
                return int(cap)
    except Exception:
        pass
    return 64 << 20


def _pick_hidden_tile(H):
    for cand in (1024, 512, 256, 128):
        if H % cand == 0:
            return cand
    return H  # tiny / odd H: keep it whole (full-dim block is always legal)


# ---------------------------------------------------------------------------
# Kernels
# ---------------------------------------------------------------------------

def mlp_resident_kernel(x_ref, wfc_ref, bfc_ref, wproj_ref, bproj_ref, o_ref):
    # Whole weight matrices are VMEM-resident (constant index maps: fetched
    # once, reused across all row tiles).  Two MXU matmuls, f32 accumulation.
    h = jnp.dot(x_ref[...], wfc_ref[...], preferred_element_type=jnp.float32)
    h = h + bfc_ref[...].astype(jnp.float32)
    g = _gelu_tanh(h)                                   # f32 on VPU/EUP
    out = jnp.dot(g.astype(wproj_ref.dtype), wproj_ref[...],
                  preferred_element_type=jnp.float32)
    out = out + bproj_ref[...].astype(jnp.float32)
    o_ref[...] = out.astype(o_ref.dtype)


def mlp_tiled_kernel(x_ref, wfc_ref, bfc_ref, wproj_ref, bproj_ref, o_ref,
                     acc_ref):
    # x_ref:     (tm, E)           -- native compute dtype (f32 or bf16)
    # wfc_ref:   (E, th)           bfc_ref:   (1, th)
    # wproj_ref: (th, E)           bproj_ref: (1, E)
    # o_ref:     (tm, E)
    # acc_ref:   (tm, E) f32 scratch accumulator (persists across h steps)
    h_idx = pl.program_id(1)

    @pl.when(h_idx == 0)
    def _():
        # Seed the accumulator with the projection bias -> finalize is a pure
        # cast+store (saves one (tm, E) VPU add per row tile).
        acc_ref[...] = jnp.broadcast_to(
            bproj_ref[...].astype(jnp.float32), acc_ref.shape)

    # fc chunk: (tm, th) = x @ W_fc[:, h_tile]  (MXU, f32 accumulate)
    h = jnp.dot(x_ref[...], wfc_ref[...], preferred_element_type=jnp.float32)
    h = h + bfc_ref[...].astype(jnp.float32)
    g = _gelu_tanh(h)

    # partial proj: acc += g @ W_proj[h_tile, :]
    acc_ref[...] += jnp.dot(g.astype(wproj_ref.dtype), wproj_ref[...],
                            preferred_element_type=jnp.float32)

    @pl.when(h_idx == pl.num_programs(1) - 1)
    def _():
        o_ref[...] = acc_ref[...].astype(o_ref.dtype)


# ---------------------------------------------------------------------------
# Wrapper
# ---------------------------------------------------------------------------

def mlp_pallas(x, w_fc, b_fc, w_proj, b_proj, *, tm=None, th=None,
               compute_dtype=None, residency="auto"):
    """x: (B, T, E).  w_fc: (E, 4E), b_fc: (4E,), w_proj: (4E, E), b_proj: (E,).

    compute_dtype: optional MXU operand dtype (e.g. jnp.bfloat16); f32
      accumulation is always used, output keeps the caller's dtype.
    residency: "auto" | "resident" | "tiled".
    """
    assert residency in ("auto", "resident", "tiled")
    B, T, E = x.shape
    H = w_fc.shape[1]
    M = B * T
    out_dtype = x.dtype

    if compute_dtype is not None:
        cd = jnp.dtype(compute_dtype)
        x = x.astype(cd)
        w_fc = w_fc.astype(cd)
        b_fc = b_fc.astype(cd)
        w_proj = w_proj.astype(cd)
        b_proj = b_proj.astype(cd)

    x_bytes = jnp.dtype(x.dtype).itemsize
    w_bytes = jnp.dtype(w_fc.dtype).itemsize

    vmem_cap = _vmem_capacity_bytes()
    budget = vmem_cap - (8 << 20)     # headroom for compiler internal scratch

    # --- row tile: large enough to be compute-bound; >=2 tiles when there is
    # enough work so both v7x TensorCores get a share of the "parallel" axis;
    # a single tile for small M on single-TC chips (no weight re-streaming).
    if tm is None:
        tm = 512 if M >= 1024 else _round_up(M, 8)
    tm = max(8, min(_round_up(tm, 8), 1024, _round_up(M, 8)))

    def resident_bytes(tm_):
        return (2 * tm_ * E * x_bytes            # x tiles (double-buffered)
                + 2 * tm_ * E * x_bytes          # out tiles
                + 2 * E * H * w_bytes            # W_fc (resident, 2x buffer alloc)
                + 2 * H * E * w_bytes            # W_proj
                + 2 * max(H, 128) * w_bytes      # b_fc
                + 2 * max(E, 128) * w_bytes      # b_proj
                + 2 * tm_ * H * 4)               # f32 hidden/GELU temporaries

    def tiled_bytes(tm_, th_):
        return (2 * tm_ * E * x_bytes            # x tiles
                + 2 * tm_ * E * x_bytes          # out tiles
                + 2 * E * th_ * w_bytes          # W_fc tile
                + 2 * th_ * E * w_bytes          # W_proj tile
                + 2 * max(th_, 128) * w_bytes    # b_fc tile
                + 2 * max(E, 128) * w_bytes      # b_proj
                + tm_ * E * 4                    # f32 accumulator scratch
                + 2 * tm_ * th_ * 4)             # f32 hidden/GELU temporaries

    use_resident = residency == "resident"
    if residency == "auto":
        tm_r = tm
        while resident_bytes(tm_r) + (2 << 20) > budget and tm_r > 128:
            tm_r = max(128, _round_up(tm_r // 2, 8))
        if resident_bytes(tm_r) + (2 << 20) <= budget:
            use_resident = True
            tm = tm_r

    if use_resident:
        M_pad = _round_up(M, tm)
        grid = (M_pad // tm,)
        vmem_limit = int(min(max(resident_bytes(tm) + (4 << 20), 32 << 20),
                             budget))
        kernel = mlp_resident_kernel
        in_specs = [
            pl.BlockSpec((tm, E), lambda i: (i, 0)),   # x rows
            pl.BlockSpec((E, H), lambda i: (0, 0)),    # W_fc, fetched once
            pl.BlockSpec((1, H), lambda i: (0, 0)),    # b_fc
            pl.BlockSpec((H, E), lambda i: (0, 0)),    # W_proj, fetched once
            pl.BlockSpec((1, E), lambda i: (0, 0)),    # b_proj
        ]
        out_specs = pl.BlockSpec((tm, E), lambda i: (i, 0))
        scratch_shapes = []
        dim_sem = ("parallel",)
    else:
        if th is None:
            th = _pick_hidden_tile(H)
        if H % th != 0:
            th = H
        # Shrink tiles until the footprint fits this chip's VMEM budget.
        while tiled_bytes(tm, th) + (2 << 20) > budget:
            if th >= 256 and th % 2 == 0 and H % (th // 2) == 0:
                th //= 2
            elif tm > 128:
                tm = max(128, _round_up(tm // 2, 8))
            else:
                break
        M_pad = _round_up(M, tm)
        grid = (M_pad // tm, H // th)
        vmem_limit = int(min(max(tiled_bytes(tm, th) + (4 << 20), 32 << 20),
                             budget))
        kernel = mlp_tiled_kernel
        in_specs = [
            pl.BlockSpec((tm, E), lambda i, h: (i, 0)),   # x rows (const in h)
            pl.BlockSpec((E, th), lambda i, h: (0, h)),   # W_fc column tile
            pl.BlockSpec((1, th), lambda i, h: (0, h)),   # b_fc tile
            pl.BlockSpec((th, E), lambda i, h: (h, 0)),   # W_proj row tile
            pl.BlockSpec((1, E), lambda i, h: (0, 0)),    # b_proj
        ]
        out_specs = pl.BlockSpec((tm, E), lambda i, h: (i, 0))
        scratch_shapes = [pltpu.VMEM((tm, E), jnp.float32)]
        dim_sem = ("parallel", "arbitrary")

    x2 = x.reshape(M, E)
    if M_pad != M:
        x2 = jnp.pad(x2, ((0, M_pad - M), (0, 0)))
    bfc2 = b_fc.reshape(1, H)
    bproj2 = b_proj.reshape(1, E)

    out = pl.pallas_call(
        kernel,
        out_shape=jax.ShapeDtypeStruct((M_pad, E), out_dtype),
        grid_spec=pltpu.PrefetchScalarGridSpec(
            num_scalar_prefetch=0,
            grid=grid,
            in_specs=in_specs,
            out_specs=out_specs,
            scratch_shapes=scratch_shapes,
        ),
        compiler_params=pltpu.CompilerParams(
            dimension_semantics=dim_sem,
            vmem_limit_bytes=vmem_limit,
        ),
    )(x2, w_fc, bfc2, w_proj, bproj2)

    return out[:M].reshape(B, T, E)


def mlp_reference(x, w_fc, b_fc, w_proj, b_proj):
    h = jnp.einsum("bte,eh->bth", x, w_fc) + b_fc
    g = _gelu_tanh(h)
    return jnp.einsum("bth,he->bte", g, w_proj) + b_proj


if __name__ == "__main__":
    # config.n_embd = 32, batch=2, seq=8 (correctness-scale config; benchmark
    # at real sizes where E is a multiple of 128 for lane-dense stores).
    B, T, E = 2, 8, 32
    H = 4 * E

    key = jax.random.PRNGKey(0)
    kx, k1, k2, k3, k4 = jax.random.split(key, 5)

    x = jax.random.normal(kx, (B, T, E), dtype=jnp.float32)

    # PyTorch nn.Linear stores weight as (out, in); generate in that
    # convention then transpose so the kernel computes x @ W + b.
    w_fc_t = jax.random.normal(k1, (H, E), dtype=jnp.float32) * (1.0 / math.sqrt(E))
    b_fc = jax.random.normal(k2, (H,), dtype=jnp.float32) * 0.01
    w_proj_t = jax.random.normal(k3, (E, H), dtype=jnp.float32) * (1.0 / math.sqrt(H))
    b_proj = jax.random.normal(k4, (E,), dtype=jnp.float32) * 0.01

    w_fc = w_fc_t.T       # (E, H)
    w_proj = w_proj_t.T   # (H, E)

    y_ref = mlp_reference(x, w_fc, b_fc, w_proj, b_proj)

    # 1) default (resident-weight) path, f32
    y = jax.block_until_ready(mlp_pallas(x, w_fc, b_fc, w_proj, b_proj))
    assert y.shape == (B, T, E)
    assert jnp.allclose(y, y_ref, atol=1e-4, rtol=1e-4), "resident path mismatch"

    # 2) forced H-tiled fallback path, f32
    y_t = jax.block_until_ready(
        mlp_pallas(x, w_fc, b_fc, w_proj, b_proj, residency="tiled"))
    assert jnp.allclose(y_t, y_ref, atol=1e-4, rtol=1e-4), "tiled path mismatch"

    # 3) bf16 MXU operands (f32 accumulation) -- loose tolerance vs f32 ref
    y_bf = jax.block_until_ready(
        mlp_pallas(x, w_fc, b_fc, w_proj, b_proj, compute_dtype=jnp.bfloat16))
    assert jnp.allclose(y_bf, y_ref, atol=1e-1, rtol=1e-1), "bf16 path mismatch"

    print("KERNEL_OK")
</pallas_src>

<mosaic_0001>
module attributes {stable_mosaic.version = 11 : i64} {
  func.func @mlp_resident_kernel(%arg0: i32, %arg1: memref<16x32xf32, #tpu.memory_space<vmem>>, %arg2: memref<32x128xf32, #tpu.memory_space<vmem>>, %arg3: memref<1x128xf32, #tpu.memory_space<vmem>>, %arg4: memref<128x32xf32, #tpu.memory_space<vmem>>, %arg5: memref<1x32xf32, #tpu.memory_space<vmem>>, %arg6: memref<16x32xf32, #tpu.memory_space<vmem>>) attributes {dimension_semantics = [#tpu.dimension_semantics<parallel>], iteration_bounds = array<i64: 1>, scalar_prefetch = 0 : i64, scratch_operands = 0 : i64, tpu.core_type = #tpu.core_type<tc>, window_params = [{transform_indices = @transform_0, window_bounds = array<i64: 16, 32>}, {pipeline_mode = #tpu.pipeline_mode<synchronous>, transform_indices = @transform_1, window_bounds = array<i64: 32, 128>}, {pipeline_mode = #tpu.pipeline_mode<synchronous>, transform_indices = @transform_2, window_bounds = array<i64: 1, 128>}, {pipeline_mode = #tpu.pipeline_mode<synchronous>, transform_indices = @transform_3, window_bounds = array<i64: 128, 32>}, {pipeline_mode = #tpu.pipeline_mode<synchronous>, transform_indices = @transform_4, window_bounds = array<i64: 1, 32>}, {transform_indices = @transform_5, window_bounds = array<i64: 16, 32>}]} {
    %c0 = arith.constant 0 : index
    %c0_0 = arith.constant 0 : index
    %0 = vector.load %arg1[%c0, %c0_0] : memref<16x32xf32, #tpu.memory_space<vmem>>, vector<16x32xf32>
    %c0_1 = arith.constant 0 : index
    %c0_2 = arith.constant 0 : index
    %1 = vector.load %arg2[%c0_1, %c0_2] : memref<32x128xf32, #tpu.memory_space<vmem>>, vector<32x128xf32>
    %cst = arith.constant dense<0.000000e+00> : vector<16x128xf32>
    %2 = tpu.matmul %0, %1, %cst {dimension_numbers = #tpu.dot_dimension_numbers<[1], [0], [0], [1], [0, 0, 1, 1], [], []>} : vector<16x32xf32>, vector<32x128xf32>, vector<16x128xf32> -> vector<16x128xf32>
    %c0_3 = arith.constant 0 : index
    %c0_4 = arith.constant 0 : index
    %3 = vector.load %arg3[%c0_3, %c0_4] : memref<1x128xf32, #tpu.memory_space<vmem>>, vector<1x128xf32>
    %4 = vector.broadcast %3 : vector<1x128xf32> to vector<16x128xf32>
    %5 = arith.addf %2, %4 : vector<16x128xf32>
    %cst_5 = arith.constant 5.000000e-01 : f32
    %6 = vector.broadcast %cst_5 : f32 to vector<16x128xf32>
    %7 = arith.mulf %6, %5 : vector<16x128xf32>
    %cst_6 = arith.constant 4.471500e-02 : f32
    %8 = vector.broadcast %cst_6 : f32 to vector<16x128xf32>
    %9 = arith.mulf %8, %5 : vector<16x128xf32>
    %10 = arith.mulf %9, %5 : vector<16x128xf32>
    %11 = arith.mulf %10, %5 : vector<16x128xf32>
    %12 = arith.addf %5, %11 : vector<16x128xf32>
    %cst_7 = arith.constant 0.797884583 : f32
    %13 = vector.broadcast %cst_7 : f32 to vector<16x128xf32>
    %14 = arith.mulf %13, %12 : vector<16x128xf32>
    %15 = math.tanh %14 : vector<16x128xf32>
    %cst_8 = arith.constant 1.000000e+00 : f32
    %16 = vector.broadcast %cst_8 : f32 to vector<16x128xf32>
    %17 = arith.addf %16, %15 : vector<16x128xf32>
    %18 = arith.mulf %7, %17 : vector<16x128xf32>
    %c0_9 = arith.constant 0 : index
    %c0_10 = arith.constant 0 : index
    %19 = vector.load %arg4[%c0_9, %c0_10] : memref<128x32xf32, #tpu.memory_space<vmem>>, vector<128x32xf32>
    %cst_11 = arith.constant dense<0.000000e+00> : vector<16x32xf32>
    %20 = tpu.matmul %18, %19, %cst_11 {dimension_numbers = #tpu.dot_dimension_numbers<[1], [0], [0], [1], [0, 0, 1, 1], [], []>} : vector<16x128xf32>, vector<128x32xf32>, vector<16x32xf32> -> vector<16x32xf32>
    %c0_12 = arith.constant 0 : index
    %c0_13 = arith.constant 0 : index
    %21 = vector.load %arg5[%c0_12, %c0_13] : memref<1x32xf32, #tpu.memory_space<vmem>>, vector<1x32xf32>
    %22 = vector.broadcast %21 : vector<1x32xf32> to vector<16x32xf32>
    %23 = arith.addf %20, %22 : vector<16x32xf32>
    %c0_14 = arith.constant 0 : index
    %c0_15 = arith.constant 0 : index
    %24 = vector.load %arg6[%c0_14, %c0_15] : memref<16x32xf32, #tpu.memory_space<vmem>>, vector<16x32xf32>
    tpu.vector_store %arg6[%c0_14, %c0_15], %23 {strides = array<i32>} : memref<16x32xf32, #tpu.memory_space<vmem>>, vector<16x32xf32>,
    return
  }
  func.func @transform_0(%arg0: i32) -> (i32, i32) {
    %c0_i32 = arith.constant 0 : i32
    %c0_i32_0 = arith.constant 0 : i32
    return %arg0, %c0_i32 : i32, i32
  }
  func.func @transform_1(%arg0: i32) -> (i32, i32) {
    %c0_i32 = arith.constant 0 : i32
    %c0_i32_0 = arith.constant 0 : i32
    %c0_i32_1 = arith.constant 0 : i32
    return %c0_i32, %c0_i32_0 : i32, i32
  }
  func.func @transform_2(%arg0: i32) -> (i32, i32) {
    %c0_i32 = arith.constant 0 : i32
    %c0_i32_0 = arith.constant 0 : i32
    %c0_i32_1 = arith.constant 0 : i32
    return %c0_i32, %c0_i32_0 : i32, i32
  }
  func.func @transform_3(%arg0: i32) -> (i32, i32) {
    %c0_i32 = arith.constant 0 : i32
    %c0_i32_0 = arith.constant 0 : i32
    %c0_i32_1 = arith.constant 0 : i32
    return %c0_i32, %c0_i32_0 : i32, i32
  }
  func.func @transform_4(%arg0: i32) -> (i32, i32) {
    %c0_i32 = arith.constant 0 : i32
    %c0_i32_0 = arith.constant 0 : i32
    %c0_i32_1 = arith.constant 0 : i32
    return %c0_i32, %c0_i32_0 : i32, i32
  }
  func.func @transform_5(%arg0: i32) -> (i32, i32) {
    %c0_i32 = arith.constant 0 : i32
    %c0_i32_0 = arith.constant 0 : i32
    return %arg0, %c0_i32 : i32, i32
  }
}

</mosaic_0001>

<bundles_post_ra>
// kernel: tpu_custom_call.1
= control target key start
LH: loop header
LB: loop body
LE: loop exit
PB: predicated region body
PF: predicated region fallthrough
CT: control target
= control target key end

     0   :  { %vm34_vm0 = vcmask 261120   ;;  %s516_s0 = inlined_call_operand.vmem [shape: f32[16,32], index: 0, kind: input, shape index: {}]   ;;  %s517_s1 = inlined_call_operand.vmem [shape: f32[32,128], index: 1, kind: input, shape index: {}]   ;;  %s518_s2 = inlined_call_operand.vmem [shape: f32[1,128], index: 2, kind: input, shape index: {}]   ;;  %s519_s3 = inlined_call_operand.vmem [shape: f32[128,32], index: 3, kind: input, shape index: {}]   ;;  %s520_s4 = inlined_call_operand.vmem [shape: f32[1,32], index: 4, kind: input, shape index: {}]   ;;  %s521_s5 = inlined_call_operand.hbm [shape: f32[16,32], index: 5, kind: output, shape index: {}]  }
   0x1   :  { %v23_v0 = vld [vmem:[%s517_s1] sm:$0xff]  ;;  %v24_v1 = vld [vmem:[%s517_s1 + $0x8] sm:$0xff]  ;;  %v25_v2 = vld [vmem:[%s517_s1 + $0x10] sm:$0xff] }
   0x2   :  { %v324_v3 = vpack.c.bf16 %v24_v1, %v23_v0  ;;  %v26_v4 = vld [vmem:[%s517_s1 + $0x18] sm:$0xff]  ;;  %v21_v5 = vld [vmem:[%s516_s0] sm:$0xff]  ;;  %v135_v8 = vld [vmem:[%s519_s3 + $0x8] sm:$0xff] }
   0x3   :  { %v328_v6 = vpack.c.bf16 %v26_v4, %v25_v2  ;;  %286 = vmatprep.mubr.msk.f32.mxu0 %vm34_vm0, %v21_v5  ;;  %v134_v7 = vld [vmem:[%s519_s3] sm:$0xff] }
   0x4   :  { %10 = vsyncpa [#allocation3], 0  ;;  %325 = vmatprep.subr.bf16.mxu0 %v324_v3  ;;  %v332_v9 = vpack.c.bf16 %v135_v8, %v134_v7  ;;  %v22_v10 = vld [vmem:[%s516_s0 + $0x8] sm:$0xff]  ;;  %v136_v11 = vld [vmem:[%s519_s3 + $0x10] sm:$0xff]  ;;  %s395_s11 = smov [#allocation2]  }
   0x5   :  { %327 = vmatpush3.bf16.msra.mxu0 %v324_v3  ;;  %v137_v12 = vld [vmem:[%s519_s3 + $0x18] sm:$0xff]  ;;  %v138_v14 = vld [vmem:[%s519_s3 + $0x20] sm:$0xff]  ;;  %v139_v15 = vld [vmem:[%s519_s3 + $0x28] sm:$0xff]  ;;  %s239_s12 = sshll.u32 %s395_s11, 4  ;;  %s240_s12 = int_to_ptr.vmem [resolvable:$true] %s239_s12 }
   0x6   :  { %329 = vmatprep.subr.bf16.mxu0 %v328_v6  ;;  %333 = vmatprep.subr.bf16.mxu1 %v332_v9  ;;  %v336_v13 = vpack.c.bf16 %v137_v12, %v136_v11  ;;  %v340_v16 = vpack.c.bf16 %v139_v15, %v138_v14  ;;  %v140_v17 = vld [vmem:[%s519_s3 + $0x30] sm:$0xff]  ;;  %v141_v18 = vld [vmem:[%s519_s3 + $0x38] sm:$0xff]  ;;  %v142_v19 = vld [vmem:[%s519_s3 + $0x40] sm:$0xff]  ;;  %s371_s13 = scalar_lea.vmem %s240_s12, 256  ;;  %p376_p1 = scmp.lt.s32.totalorder %s240_s12, %s240_s12 }
   0x7   :  { %335 = vmatpush3.bf16.msra.mxu1 %v332_v9  ;;  %v344_v20 = vpack.c.bf16 %v141_v18, %v140_v17  ;;  %v143_v21 = vld [vmem:[%s519_s3 + $0x48] sm:$0xff]  ;;  %v144_v23 = vld [vmem:[%s519_s3 + $0x50] sm:$0xff]  ;;  %v145_v24 = vld [vmem:[%s519_s3 + $0x58] sm:$0xff]  ;;  %p372_p0 = scmp.ne.s32.totalorder %s240_s12, %s371_s13  ;;  %p377_p2 = scmp.lt.s32.totalorder %s371_s13, %s371_s13 }
   0x8   :  { %337 = vmatprep.subr.bf16.mxu1 %v336_v13  ;;  %v348_v22 = vpack.c.bf16 %v143_v21, %v142_v19  ;;  %v352_v25 = vpack.c.bf16 %v145_v24, %v144_v23  ;;  %v146_v26 = vld [vmem:[%s519_s3 + $0x60] sm:$0xff]  ;;  %v147_v27 = vld [vmem:[%s519_s3 + $0x68] sm:$0xff]  ;;  %v148_v29 = vld [vmem:[%s519_s3 + $0x70] sm:$0xff] }
   0x9   :  { %331 = vmatpush3.bf16.msra.mxu0 %v328_v6  ;;  %v356_v28 = vpack.c.bf16 %v147_v27, %v146_v26  ;;  %v149_v30 = vld [vmem:[%s519_s3 + $0x78] sm:$0xff]  ;;  %v250_v32 = vld [vmem:[%s518_s2] ss:$0 sm:$0xff]  ;;  %p378_p3 = por %p377_p2, %p376_p1 }
   0xa   :  { %v360_v31 = vpack.c.bf16 %v149_v30, %v148_v29  ;;  %v253_v55 = vld [vmem:[%s520_s4] ss:$0 sm:$0xff] }
   0xb   :  { %339 = vmatpush3.bf16.msra.mxu1 %v336_v13  ;;  %p379_p4 = pnand %p378_p3, %p372_p0 }
   0xc   :  { %287 = vmatmul.mubr.msk.f32.vlgmr.msra.gmra.mrb[0].mxu0 %vm34_vm0, %v22_v10  ;;  %341 = vmatprep.subr.bf16.mxu1 %v340_v16 }
   0xf   :  { %343 = vmatpush3.bf16.msra.mxu1 %v340_v16 }
  0x10   :  { %345 = vmatprep.subr.bf16.mxu1 %v344_v20 }
  0x13   :  { %347 = vmatpush3.bf16.msra.mxu1 %v344_v20 }
  0x14   :  { %349 = vmatprep.subr.bf16.mxu1 %v348_v22 }
  0x17   :  { %351 = vmatpush3.bf16.msra.mxu1 %v348_v22 }
  0x18   :  { %353 = vmatprep.subr.bf16.mxu1 %v352_v25 }
  0x1b   :  { %355 = vmatpush3.bf16.msra.mxu1 %v352_v25 }
  0x1c   :  { %357 = vmatprep.subr.bf16.mxu1 %v356_v28 }
  0x1f   :  { %359 = vmatpush3.bf16.msra.mxu1 %v356_v28 }
  0x20   :  { %361 = vmatprep.subr.bf16.mxu1 %v360_v31 }
  0x23   :  { %363 = vmatpush3.bf16.msra.mxu1 %v360_v31 }
  0xdf   :  { %v288_v33 = vpop.f32.mrb[0].mxu0 }
  0xe0   :  { %v113_v34 = vadd.f32 %v288_v33, %v250_v32  ;;  %v107_v35 = vpop.f32.mrb[1].mxu0 }
  0xe1   :  { %v108_v36 = vadd.f32 %v250_v32, %v107_v35 }
  0xe2   :  { %v119_v37 = vmul.f32 0.044715, %v113_v34  ;;  %v117_v52 = vmul.f32 0.5, %v113_v34 }
  0xe3   :  { %v118_v38 = vmul.f32 0.044715, %v108_v36  ;;  %v116_v50 = vmul.f32 0.5, %v108_v36 }
  0xe4   :  { %v121_v39 = vmul.f32 %v119_v37, %v113_v34 }
  0xe5   :  { %v120_v40 = vmul.f32 %v118_v38, %v108_v36 }
  0xe6   :  { %v123_v41 = vmul.f32 %v121_v39, %v113_v34 }
  0xe7   :  { %v122_v42 = vmul.f32 %v120_v40, %v108_v36 }
  0xe8   :  { %v125_v43 = vadd.f32 %v123_v41, %v113_v34 }
  0xe9   :  { %v124_v44 = vadd.f32 %v122_v42, %v108_v36 }
  0xea   :  { %v127_v45 = vmul.f32 0.7978846, %v125_v43 }
  0xeb   :  { %v126_v46 = vmul.f32 0.7978846, %v124_v44 }
  0xec   :  { %367 = vtanh.f32 %v127_v45 }
  0xed   :  { %369 = vtanh.f32 %v126_v46 }
  0xf6   :  { %v368_v47 = vpop.eup %367 }
  0xf7   :  { %v370_v48 = vpop.eup %369  ;;  %v131_v49 = vadd.f32 1.0, %v368_v47 }
  0xf8   :  { %v130_v51 = vadd.f32 1.0, %v370_v48 }
  0xf9   :  { %v133_v54 = vmul.f32 %v131_v49, %v117_v52 }
  0xfa   :  { %v132_v53 = vmul.f32 %v130_v51, %v116_v50 }
  0xfc   :  { %321 = vmatprep.mubr.f32.mxu1 %v132_v53 }
  0xfd   :  { %322 = vmatmul.mubr.f32.vlgmr.msra.gmra.mrb[0].mxu1 %v133_v54 }
 0x1d0   :  { %v323_v56 = vpop.f32.mrb[0].mxu1 }
 0x1d1   :  { %v229_v57 = vadd.f32 %v323_v56, %v253_v55  ;;  %v223_v58 = vpop.f32.mrb[1].mxu1 }
 0x1d2   :  { %v224_v59 = vadd.f32 %v253_v55, %v223_v58 }
 0x1d3   :  { %233 = vst.msk [vmem:[#allocation2 + $0x8] sm:$0xff] %vm34_vm0, %v229_v57 }
 0x1d4   :  { %232 = vst.msk [vmem:[#allocation2] sm:$0xff] %vm34_vm0, %v224_v59 }
 0x1d5   :  { %382 = shalt.err (!%p379_p4)
}
 0x1d6   :  { %s383_s15 = scalar_lea.hbm %s521_s5, 256 }
 0x1d7   :  { %p384_p5 = scmp.ne.s32.totalorder %s521_s5, %s383_s15  ;;  %p387_p6 = scmp.lt.u32.totalorder %s383_s15, %s521_s5 }
 0x1d9   :  { %p389_p7 = pnand %p387_p6, %p384_p5 }
 0x1db   :  { %392 = shalt.err (!%p389_p7)
}
 0x1dc   :  { %s396_s19 = smov 128   ;;  %s397_s20 = smov 8  }
 0x1dd   :  { %245 = dma.vmem_to_hbm [thread:$0]  %s240_s12, 256, %s521_s5, [#allocation3], %s396_s19, %s396_s19, %s397_s20  }
 0x1de   :  { %393 = dma.done.wait [#allocation3], 256  }
 0x1df   :  { %394 = vsyncadd [#allocation3], 4294967040 }
 0x1e0   :  { %249 = vsyncpa [#allocation3], 1 }

</bundles_post_ra>
